<compile_context>
chip_gen: v5e
topology: v5e:2x2
jax: 0.10.0
libtpu: 0.0.40
codegen_flags: <defaults>
</compile_context>

<pallas_src>
import jax
import jax.numpy as jnp
from jax.experimental import pallas as pl
from jax.experimental.pallas import tpu as pltpu

LANE = 128      # vreg lane width
SUBLANE = 8     # vreg sublane count (f32)


def _round_up(n, m):
    return (n + m - 1) // m * m


def _mlp_kernel(x_ref, w1_ref, b1_ref, w2_ref, b2_ref, o_ref):
    # Layer 1: cast x to bf16 in-kernel (cheap VPU op, hidden under the x DMA);
    # MXU matmul with f32 accumulation; bias + relu on VPU in f32.
    x = x_ref[...].astype(jnp.bfloat16)
    h = jnp.dot(x, w1_ref[...], preferred_element_type=jnp.float32)
    h = jnp.maximum(h + b1_ref[...], 0.0)
    # Layer 2: activation cast back to bf16 only as the MXU operand (128-wide
    # padded W2 keeps the dot MXU-shaped); accumulate in f32.
    y = jnp.dot(h.astype(w2_ref.dtype), w2_ref[...],
                preferred_element_type=jnp.float32)
    # Narrow epilogue: keep only the valid option columns, add bias, sigmoid
    # (EUP), and store the n_options-wide tile directly (masked narrow store,
    # but only ~16 B/row of HBM writeback instead of 512 B/row).
    n = o_ref.shape[-1]
    y = y[:, :n] + b2_ref[...]
    o_ref[...] = jax.nn.sigmoid(y).astype(o_ref.dtype)


def prepare_fingerprint_mlp_params(w1, b1, w2, b2):
    """One-time (load-time) weight prep: lane-dense zero padding + bf16 cast.

    w1: [fp_dim, hidden]     b1: [1, hidden] (or [hidden])
    w2: [hidden, n_options]  b2: [1, n_options] (or [n_options])
    """
    fp_dim, hidden = w1.shape
    n_options = w2.shape[1]
    fp_p = _round_up(fp_dim, LANE)
    hid_p = _round_up(hidden, LANE)
    out_p = _round_up(n_options, LANE)

    # Zero padding keeps the real outputs structurally exact: padded fingerprint
    # features contribute 0 to dot #1, padded hidden units are relu(0+0)=0 after
    # the padded bias, padded output columns never leave the kernel.
    w1p = jnp.zeros((fp_p, hid_p), jnp.bfloat16).at[:fp_dim, :hidden].set(
        w1.astype(jnp.bfloat16))
    w2p = jnp.zeros((hid_p, out_p), jnp.bfloat16).at[:hidden, :n_options].set(
        w2.astype(jnp.bfloat16))
    b1p = jnp.zeros((1, hid_p), jnp.float32).at[:, :hidden].set(
        b1.reshape(1, hidden).astype(jnp.float32))
    b2n = b2.reshape(1, n_options).astype(jnp.float32)   # stays narrow (f32)
    return {"w1": w1p, "b1": b1p, "w2": w2p, "b2": b2n,
            "fp_dim": fp_dim, "n_options": n_options}


def fingerprint_mlp_forward(x, params, *, block_batch=1024):
    """Fused 2-layer fingerprint MLP, batch-tiled with resident weights.

    x: [batch, fp_dim] (any float/int dtype; cast to bf16 inside the kernel)
    params: output of prepare_fingerprint_mlp_params
    returns sigmoid scores [batch, n_options] in f32.
    """
    batch, fp_dim = x.shape
    w1p, b1p, w2p, b2n = params["w1"], params["b1"], params["w2"], params["b2"]
    assert fp_dim == params["fp_dim"], "fingerprint length mismatch"
    fp_p, hid_p = w1p.shape
    out_p = w2p.shape[1]
    n_options = params["n_options"]

    # Batch tile: largest tile <= block_batch that still gives >= 2 grid steps
    # (v7x megacore sharding across its 2 TensorCores), rounded to 8 sublanes,
    # chosen to minimize batch padding (a batch of 513 won't pad to 1024).
    n_steps = max(pl.cdiv(batch, block_batch), 2)
    tb = min(_round_up(pl.cdiv(batch, n_steps), SUBLANE),
             _round_up(batch, SUBLANE))
    n_blocks = pl.cdiv(batch, tb)
    batch_p = n_blocks * tb

    # Only materialize a padded copy of x if actually needed (zero pad keeps the
    # feature contraction exact; padded rows are sliced off below).  x keeps its
    # stored dtype — the bf16 cast happens in-kernel.
    if batch_p != batch or fp_p != fp_dim:
        xk = jnp.zeros((batch_p, fp_p), x.dtype).at[:batch, :fp_dim].set(x)
    else:
        xk = x

    out = pl.pallas_call(
        _mlp_kernel,
        out_shape=jax.ShapeDtypeStruct((batch_p, n_options), jnp.float32),
        grid=(n_blocks,),
        in_specs=[
            pl.BlockSpec((tb, fp_p), lambda i: (i, 0)),       # x tile (pipelined)
            pl.BlockSpec((fp_p, hid_p), lambda i: (0, 0)),    # W1 resident
            pl.BlockSpec((1, hid_p), lambda i: (0, 0)),       # b1 resident
            pl.BlockSpec((hid_p, out_p), lambda i: (0, 0)),   # W2 resident
            pl.BlockSpec((1, n_options), lambda i: (0, 0)),   # b2 resident (narrow)
        ],
        # Narrow (n_options-wide) output: last dim equals the full array dim,
        # so the (8,128) constraint is satisfied without padding.
        out_specs=pl.BlockSpec((tb, n_options), lambda i: (i, 0)),
        compiler_params=pltpu.CompilerParams(
            dimension_semantics=("parallel",)),
    )(xk, w1p, b1p, w2p, b2n)

    if batch_p != batch:
        out = out[:batch]
    return out


if __name__ == "__main__":
    # Small, deterministic shapes consistent with a fingerprint -> options model.
    batch = 256      # fingerprints per batch (forced to >=2 grid steps: tb=128)
    fp_dim = 512     # fingerprint length (already lane-aligned -> no x padding)
    hidden = 64      # hidden width (padded to 128 at weight-prep time)
    n_options = 4    # number of ordinal label options (output stays 4 wide)

    key = jax.random.PRNGKey(0)
    kx, k1, k2, k3, k4 = jax.random.split(key, 5)

    x = (jax.random.uniform(kx, (batch, fp_dim)) > 0.5).astype(jnp.float32)  # binary fp
    w1 = jax.random.normal(k1, (fp_dim, hidden), jnp.float32) * 0.05
    b1 = jax.random.normal(k2, (1, hidden), jnp.float32) * 0.01
    w2 = jax.random.normal(k3, (hidden, n_options), jnp.float32) * 0.05
    b2 = jax.random.normal(k4, (1, n_options), jnp.float32) * 0.01

    params = prepare_fingerprint_mlp_params(w1, b1, w2, b2)   # once, at load time
    out = fingerprint_mlp_forward(x, params)
    jax.block_until_ready(out)

    # Sanity check against plain-JAX f32 reference (loose tol: bf16 MXU operands).
    ref = jax.nn.sigmoid(jnp.maximum(x @ w1 + b1, 0.0) @ w2 + b2)
    assert out.shape == (batch, n_options)
    assert jnp.allclose(out, ref, atol=2e-2), "mismatch vs reference"

    print("KERNEL_OK")
</pallas_src>

<mosaic_0001>
module attributes {stable_mosaic.version = 11 : i64} {
  func.func @_mlp_kernel(%arg0: i32, %arg1: memref<128x512xf32, #tpu.memory_space<vmem>>, %arg2: memref<512x128xbf16, #tpu.memory_space<vmem>>, %arg3: memref<1x128xf32, #tpu.memory_space<vmem>>, %arg4: memref<128x128xbf16, #tpu.memory_space<vmem>>, %arg5: memref<1x4xf32, #tpu.memory_space<vmem>>, %arg6: memref<128x4xf32, #tpu.memory_space<vmem>>) attributes {dimension_semantics = [#tpu.dimension_semantics<parallel>], iteration_bounds = array<i64: 2>, scalar_prefetch = 0 : i64, scratch_operands = 0 : i64, tpu.core_type = #tpu.core_type<tc>, window_params = [{transform_indices = @transform_0, window_bounds = array<i64: 128, 512>}, {pipeline_mode = #tpu.pipeline_mode<synchronous>, transform_indices = @transform_1, window_bounds = array<i64: 512, 128>}, {pipeline_mode = #tpu.pipeline_mode<synchronous>, transform_indices = @transform_2, window_bounds = array<i64: 1, 128>}, {pipeline_mode = #tpu.pipeline_mode<synchronous>, transform_indices = @transform_3, window_bounds = array<i64: 128, 128>}, {pipeline_mode = #tpu.pipeline_mode<synchronous>, transform_indices = @transform_4, window_bounds = array<i64: 1, 4>}, {transform_indices = @transform_5, window_bounds = array<i64: 128, 4>}]} {
    %c0 = arith.constant 0 : index
    %c0_0 = arith.constant 0 : index
    %0 = vector.load %arg1[%c0, %c0_0] : memref<128x512xf32, #tpu.memory_space<vmem>>, vector<128x512xf32>
    %1 = arith.truncf %0 : vector<128x512xf32> to vector<128x512xbf16>
    %c0_1 = arith.constant 0 : index
    %c0_2 = arith.constant 0 : index
    %2 = vector.load %arg2[%c0_1, %c0_2] : memref<512x128xbf16, #tpu.memory_space<vmem>>, vector<512x128xbf16>
    %cst = arith.constant dense<0.000000e+00> : vector<128x128xf32>
    %3 = tpu.matmul %1, %2, %cst {dimension_numbers = #tpu.dot_dimension_numbers<[1], [0], [0], [1], [0, 0, 1, 1], [], []>} : vector<128x512xbf16>, vector<512x128xbf16>, vector<128x128xf32> -> vector<128x128xf32>
    %c0_3 = arith.constant 0 : index
    %c0_4 = arith.constant 0 : index
    %4 = vector.load %arg3[%c0_3, %c0_4] : memref<1x128xf32, #tpu.memory_space<vmem>>, vector<1x128xf32>
    %5 = vector.broadcast %4 : vector<1x128xf32> to vector<128x128xf32>
    %6 = arith.addf %3, %5 : vector<128x128xf32>
    %cst_5 = arith.constant 0.000000e+00 : f32
    %7 = vector.broadcast %cst_5 : f32 to vector<128x128xf32>
    %8 = arith.maximumf %6, %7 : vector<128x128xf32>
    %9 = arith.truncf %8 : vector<128x128xf32> to vector<128x128xbf16>
    %c0_6 = arith.constant 0 : index
    %c0_7 = arith.constant 0 : index
    %10 = vector.load %arg4[%c0_6, %c0_7] : memref<128x128xbf16, #tpu.memory_space<vmem>>, vector<128x128xbf16>
    %cst_8 = arith.constant dense<0.000000e+00> : vector<128x128xf32>
    %11 = tpu.matmul %9, %10, %cst_8 {dimension_numbers = #tpu.dot_dimension_numbers<[1], [0], [0], [1], [0, 0, 1, 1], [], []>} : vector<128x128xbf16>, vector<128x128xbf16>, vector<128x128xf32> -> vector<128x128xf32>
    %12 = vector.extract_strided_slice %11 {offsets = [0, 0], sizes = [128, 4], strides = [1, 1]} : vector<128x128xf32> to vector<128x4xf32>
    %c0_9 = arith.constant 0 : index
    %c0_10 = arith.constant 0 : index
    %13 = vector.load %arg5[%c0_9, %c0_10] : memref<1x4xf32, #tpu.memory_space<vmem>>, vector<1x4xf32>
    %14 = vector.broadcast %13 : vector<1x4xf32> to vector<128x4xf32>
    %15 = arith.addf %12, %14 : vector<128x4xf32>
    %16 = arith.negf %15 : vector<128x4xf32>
    %17 = math.exp %16 : vector<128x4xf32>
    %cst_11 = arith.constant 1.000000e+00 : f32
    %18 = vector.broadcast %cst_11 : f32 to vector<128x4xf32>
    %19 = arith.addf %18, %17 : vector<128x4xf32>
    %20 = arith.divf %18, %19 : vector<128x4xf32>
    %c0_12 = arith.constant 0 : index
    %c0_13 = arith.constant 0 : index
    %21 = vector.load %arg6[%c0_12, %c0_13] : memref<128x4xf32, #tpu.memory_space<vmem>>, vector<128x4xf32>
    tpu.vector_store %arg6[%c0_12, %c0_13], %20 {strides = array<i32>} : memref<128x4xf32, #tpu.memory_space<vmem>>, vector<128x4xf32>,
    return
  }
  func.func @transform_0(%arg0: i32) -> (i32, i32) {
    %c0_i32 = arith.constant 0 : i32
    %c0_i32_0 = arith.constant 0 : i32
    return %arg0, %c0_i32 : i32, i32
  }
  func.func @transform_1(%arg0: i32) -> (i32, i32) {
    %c0_i32 = arith.constant 0 : i32
    %c0_i32_0 = arith.constant 0 : i32
    %c0_i32_1 = arith.constant 0 : i32
    return %c0_i32, %c0_i32_0 : i32, i32
  }
  func.func @transform_2(%arg0: i32) -> (i32, i32) {
    %c0_i32 = arith.constant 0 : i32
    %c0_i32_0 = arith.constant 0 : i32
    %c0_i32_1 = arith.constant 0 : i32
    return %c0_i32, %c0_i32_0 : i32, i32
  }
  func.func @transform_3(%arg0: i32) -> (i32, i32) {
    %c0_i32 = arith.constant 0 : i32
    %c0_i32_0 = arith.constant 0 : i32
    %c0_i32_1 = arith.constant 0 : i32
    return %c0_i32, %c0_i32_0 : i32, i32
  }
  func.func @transform_4(%arg0: i32) -> (i32, i32) {
    %c0_i32 = arith.constant 0 : i32
    %c0_i32_0 = arith.constant 0 : i32
    %c0_i32_1 = arith.constant 0 : i32
    return %c0_i32, %c0_i32_0 : i32, i32
  }
  func.func @transform_5(%arg0: i32) -> (i32, i32) {
    %c0_i32 = arith.constant 0 : i32
    %c0_i32_0 = arith.constant 0 : i32
    return %arg0, %c0_i32 : i32, i32
  }
}

</mosaic_0001>

<bundles_post_ra>
// kernel: tpu_custom_call.1
= control target key start
LH: loop header
LB: loop body
LE: loop exit
PB: predicated region body
PF: predicated region fallthrough
CT: control target
= control target key end

     0   :  { %10 = vsyncpa [#allocation3], 0  ;;  %s2242_s0 = inlined_call_operand.hbm [shape: f32[256,512], index: 0, kind: input, shape index: {}]   ;;  %s2243_s1 = inlined_call_operand.hbm [shape: bf16[512,128], index: 1, kind: input, shape index: {}]   ;;  %s2244_s2 = inlined_call_operand.vmem [shape: f32[1,128], index: 2, kind: input, shape index: {}]   ;;  %s2245_s3 = inlined_call_operand.hbm [shape: bf16[128,128], index: 3, kind: input, shape index: {}]   ;;  %s2246_s4 = inlined_call_operand.vmem [shape: f32[1,4], index: 4, kind: input, shape index: {}]   ;;  %s2247_s5 = inlined_call_operand.vmem [shape: f32[256,4], index: 5, kind: output, shape index: {}]  }
   0x1   :  { %12 = vsyncpa [#allocation3 + $0x1], 0 }
   0x2   :  { %13 = vsyncpa [#allocation5], 0  ;;  %s1955_s18 = smov 0   ;;  %s1957_s19 = smov 0  }
   0x3   :  { %s1959_s20 = smov 0   ;;  %s1961_s21 = smov 0  }
   0x4 LB: > { %s1399_s22 = sadd.s32 4294967295, %s1917_s21   ;;  %p39_p0 = scmp.ne.s32.totalorder %s1909_s19, %s1905_s18  ;;  %s1917_s21 = sphi %s1961_s21, %s2255_s21   ;;  %s1913_s20 = sphi %s1959_s20, %s2254_s20   ;;  %s1909_s19 = sphi %s1957_s19, %s2253_s19   ;;  %s1905_s18 = sphi %s1955_s18, %s2252_s18  }
   0x5   : > { %p1977_p1 = scmp.eq.s32.totalorder %s1399_s22, 0  ;;  %p1401_p2 = scmp.ge.s32.totalorder %s1917_s21, 1 }
   0x6   : > { %p160_p3 = scmp.lt.s32.totalorder %s1917_s21, 3  ;;  %s171_s27 = sshll.u32 %s2243_s1, 4  ;;  %s172_s27 = int_to_ptr.hbm [resolvable:$true] %s171_s27 }
   0x7   : > { %p1985_p4 = por %p1977_p1, %p39_p0  ;;  %s1919_s29 = smov [#allocation4]  }
   0x8   : > { %p1992_p5 = pnand %p1401_p2, %p160_p3  ;;  %s173_s30 = sshll.u32 %s1919_s29, 4  ;;  %s174_s30 = int_to_ptr.vmem [resolvable:$true] %s173_s30 }
   0x9   : > { %s188_s8 = sshll.u32 %s2245_s3, 4  ;;  %s1920_s9 = smov 64   ;;  %s189_s8 = int_to_ptr.hbm [resolvable:$true] %s188_s8 }
   0xa   : > { %p1669_p6 = pneg %p1992_p5  ;;  %s1921_s10 = smov 4  }
   0xb   : > { %s1922_s11 = smov [#allocation6]   ;;  %s2004_s13 = sadd.s32 1, %s1917_s21  }
   0xc   : > { %p1670_p7 = pnand %p1669_p6, %p1977_p1  ;;  %s190_s12 = sshll.u32 %s1922_s11, 4  ;;  %s191_s12 = int_to_ptr.vmem [resolvable:$true] %s190_s12 }
   0xd   : > { %s26_s14 = sadd.s32 1, %s1913_s20  ;;  %s23_s15 = ssub.s32 %s1917_s21, %s2004_s13 }
   0xe   : > { %1672 = dma.hbm_to_vmem [thread:$0]  (!%p1670_p7), %s172_s27, 4096, %s174_s30, [#allocation5], %s1920_s9, %s1920_s9, %s1921_s10  }
   0xf   : > { %1675 = dma.hbm_to_vmem [thread:$0]  (!%p1670_p7), %s189_s8, 1024, %s191_s12, [#allocation5], %s1920_s9, %s1920_s9, %s1921_s10  }
  0x10   : > { %p33_p8 = scmp.ne.s32.totalorder %s1913_s20, %s1909_s19  ;;  %p24_p9 = scmp.eq.s32.totalorder %s23_s15, 0 }
  0x11   : > { %p34_p10 = scmp.eq.s32.totalorder %s1917_s21, 0  ;;  %p1682_p11 = scmp.lt.s32.totalorder %s1917_s21, 2 }
  0x12   : > { %s207_s16 = sand.u32 1, %s1913_s20   ;;  %s1594_s25 = sshll.u32 %s1917_s21, 9 }
  0x13   : > { %s2015_s17 = scalar_select %p24_p9, %s1913_s20, %s26_s14  }
  0x14   : > { %p35_p12 = por %p34_p10, %p33_p8  ;;  %s1405_s18 = sshll.u32 %s207_s16, 9 }
  0x15   : > { %s217_s29 = scalar_lea.hbm %s2242_s0, %s1594_s25  ;;  %s211_s6 = scalar_lea.vmem [#allocation2], %s1405_s18 }
  0x16   : > { %s218_s30 = sshll.u32 %s217_s29, 4  ;;  %s220_s7 = sshll.u32 %s211_s6, 4  ;;  %s219_s30 = int_to_ptr.hbm [resolvable:$true] %s218_s30  ;;  %s221_s7 = int_to_ptr.vmem [resolvable:$true] %s220_s7 }
  0x17   : > { %p2021_p13 = pnand %p1682_p11, %p35_p12  ;;  %s208_s9 = scalar_lea.sflag [#allocation3], %s207_s16 }
  0x18   : > { %s1849_s10 = sshra.s32 %s219_s30, 4  ;;  %s1856_s15 = scalar_lea.hbm %s2242_s0, 1024  ;;  %s1850_s10 = int_to_ptr.hbm [resolvable:$true] %s1849_s10 }
  0x19   : > { %s1851_s11 = scalar_lea.hbm %s1850_s10, 512  ;;  %p1853_p2 = pneg %p2021_p13 }
  0x1a   : > { %p1852_p0 = scmp.ne.s32.totalorder %s1850_s10, %s1851_s11  ;;  %p1857_p7 = scmp.lt.s32.totalorder %s1850_s10, %s2242_s0 }
  0x1b   : > { %p1858_p8 = scmp.lt.s32.totalorder %s1856_s15, %s1851_s11 }
  0x1c   : > { %p1854_p3 = pnand %p1853_p2, %p1852_p0 }
  0x1d   : > { %p1859_p9 = por %p1858_p8, %p1857_p7 }
  0x1e   : > { %p1855_p6 = pneg %p1854_p3 }
  0x20   : > { %p1860_p10 = pnand %p1859_p9, %p1855_p6 }
  0x22   : > { %1863 = shalt.err (!%p1860_p10)
}
  0x23   : > { %s1923_s16 = smov 512   ;;  %s1924_s26 = smov 32  }
  0x24   : > { %1679 = dma.hbm_to_vmem [thread:$0]  (!%p2021_p13), %s219_s30, 8192, %s221_s7, %s208_s9, %s1923_s16, %s1923_s16, %s1924_s26  }
  0x25   : > { %232 = sbr.rel (%p1992_p5) target bundleno = 535 (0x217), region = 40  ;;  %s234_s27 = sand.u32 (!%p1992_p5), 1, %s1909_s19  }
  0x26   : > { %s1410_s29 = sshll.u32 (!%p1992_p5), %s234_s27, 9  ;;  %s235_s6 = scalar_lea.sflag (!%p1992_p5), [#allocation3], %s234_s27 }
  0x27   : > { %s2038_s12 = scalar_lea.vmem (!%p1992_p5), [#allocation2], %s1410_s29 }
  0x2a   : > { %1896 = dma.done.wait (%p1985_p4), %s235_s6, 8192  }
  0x2b   : > { %1898 = vsyncadd (%p1985_p4), %s235_s6, 4294959104 }
  0x2c   : > { %1900 = dma.done.wait (%p1977_p1), [#allocation5], 5120  }
  0x2d   : > { %1902 = vsyncadd (%p1977_p1), [#allocation5], 4294962176  ;;  %v1602_v0 = vld [vmem:[#allocation4 + $0x38] sm:$0xff]  ;;  %v1601_v1 = vld [vmem:[#allocation4 + $0x30] sm:$0xff]  ;;  %s1413_s7 = sshll.u32 %s1399_s22, 4  ;;  %vm1296_vm3 = vcmask 31744  }
  0x2e   : > { %1635 = vmatpush.bf16.msra.mxu1 %v1602_v0  ;;  %1636 = vmatpush.bf16.msra.mxu2 %v1602_v0  ;;  %v1600_v2 = vld [vmem:[#allocation4 + $0x28] sm:$0xff]  ;;  %v1599_v3 = vld [vmem:[#allocation4 + $0x20] sm:$0xff]  ;;  %v1598_v4 = vld [vmem:[#allocation4 + $0x18] sm:$0xff]  ;;  %p278_p1 = scmp.lt.s32.totalorder %s1413_s7, 31 }
  0x2f   : > { %1637 = vmatpush.bf16.msra.mxu3 %v1602_v0  ;;  %639 = vmatpush.bf16.msra.mxu0 %v1602_v0  ;;  %v1597_v5 = vld [vmem:[#allocation4 + $0x10] sm:$0xff]  ;;  %v1596_v6 = vld [vmem:[#allocation4 + $0x8] sm:$0xff]  ;;  %v1595_v7 = vld [vmem:[#allocation4] sm:$0xff] }
  0x30   : > { %v299_v8 = vld [vmem:[%s2038_s12 + $0x80] sm:$0xff]  ;;  %v1618_v14 = vld [vmem:[#allocation4 + $0xb8] sm:$0xff]  ;;  %v1617_v22 = vld [vmem:[#allocation4 + $0xb0] sm:$0xff]  ;;  %s2257_s7 = smov (!%p278_p1, %s1413_s7), 31 }
  0x31   : > { %v303_v9 = vld [vmem:[%s2038_s12 + $0xa0] sm:$0xff]  ;;  %v1610_v15 = vld [vmem:[#allocation4 + $0x78] sm:$0xff]  ;;  %v1609_v23 = vld [vmem:[#allocation4 + $0x70] sm:$0xff]  ;;  %s1414_s8 = sshll.u32 %s2257_s7, 3 }
  0x32   : > { %1638 = vmatpush.bf16.msra.mxu1 %v1601_v1  ;;  %1639 = vmatpush.bf16.msra.mxu2 %v1601_v1  ;;  %v315_v10 = vld [vmem:[%s2038_s12 + $0x100] sm:$0xff]  ;;  %v1626_v16 = vld [vmem:[#allocation4 + $0xf8] sm:$0xff]  ;;  %v355_v17 = vpack.c.bf16 %v303_v9, %v299_v8  ;;  %v1625_v24 = vld [vmem:[#allocation4 + $0xf0] sm:$0xff]  ;;  %s2183_s9 = scalar_lea.vmem %s2247_s5, %s1414_s8 }
  0x33   : > { %1640 = vmatpush.bf16.msra.mxu3 %v1601_v1  ;;  %640 = vmatpush.bf16.msra.mxu0 %v1601_v1  ;;  %v319_v11 = vld [vmem:[%s2038_s12 + $0x120] sm:$0xff]  ;;  %v1616_v26 = vld [vmem:[#allocation4 + $0xa8] sm:$0xff]  ;;  %v1614_v38 = vld [vmem:[#allocation4 + $0x98] sm:$0xff] }
  0x34   : > { %v331_v12 = vld [vmem:[%s2038_s12 + $0x180] sm:$0xff]  ;;  %v363_v18 = vpack.c.bf16 %v319_v11, %v315_v10  ;;  %v1608_v27 = vld [vmem:[#allocation4 + $0x68] sm:$0xff]  ;;  %v1606_v39 = vld [vmem:[#allocation4 + $0x58] sm:$0xff] }
  0x35   : > { %v335_v13 = vld [vmem:[%s2038_s12 + $0x1a0] sm:$0xff]  ;;  %v1624_v28 = vld [vmem:[#allocation4 + $0xe8] sm:$0xff]  ;;  %v1622_v40 = vld [vmem:[#allocation4 + $0xd8] sm:$0xff] }
  0x36   : > { %1641 = vmatpush.bf16.msra.mxu1 %v1600_v2  ;;  %1642 = vmatpush.bf16.msra.mxu2 %v1600_v2  ;;  %v371_v19 = vpack.c.bf16 %v335_v13, %v331_v12  ;;  %v283_v20 = vld [vmem:[%s2038_s12] sm:$0xff]  ;;  %v1613_v46 = vld [vmem:[#allocation4 + $0x90] sm:$0xff]  ;;  %v1612_v50 = vld [vmem:[#allocation4 + $0x88] sm:$0xff] }
  0x37   : > { %1643 = vmatpush.bf16.msra.mxu3 %v1600_v2  ;;  %641 = vmatpush.bf16.msra.mxu0 %v1600_v2  ;;  %v287_v21 = vld [vmem:[%s2038_s12 + $0x20] sm:$0xff]  ;;  %v1605_v47 = vld [vmem:[#allocation4 + $0x50] sm:$0xff]  ;;  %v1604_v51 = vld [vmem:[#allocation4 + $0x48] sm:$0xff] }
  0x38   : > { %v347_v25 = vpack.c.bf16 %v287_v21, %v283_v20  ;;  %v1615_v29 = vld [vmem:[#allocation4 + $0xa0] sm:$0xff]  ;;  %v1621_v48 = vld [vmem:[#allocation4 + $0xd0] sm:$0xff]  ;;  %v1620_v52 = vld [vmem:[#allocation4 + $0xc8] sm:$0xff] }
  0x39   : > { %v1607_v30 = vld [vmem:[#allocation4 + $0x60] sm:$0xff]  ;;  %v284_v56 = vld [vmem:[%s2038_s12 + $0x8] sm:$0xff]  ;;  %v285_v58 = vld [vmem:[%s2038_s12 + $0x10] sm:$0xff] }
  0x3a   : > { %1644 = vmatpush.bf16.msra.mxu1 %v1599_v3  ;;  %1645 = vmatpush.bf16.msra.mxu2 %v1599_v3  ;;  %v1623_v31 = vld [vmem:[#allocation4 + $0xe0] sm:$0xff]  ;;  %v288_v57 = vld [vmem:[%s2038_s12 + $0x28] sm:$0xff]  ;;  %v289_v59 = vld [vmem:[%s2038_s12 + $0x30] sm:$0xff] }
  0x3b   : > { %1646 = vmatpush.bf16.msra.mxu3 %v1599_v3  ;;  %642 = vmatpush.bf16.msra.mxu0 %v1599_v3  ;;  %v307_v32 = vld [vmem:[%s2038_s12 + $0xc0] sm:$0xff]  ;;  %v286_v60 = vld [vmem:[%s2038_s12 + $0x18] sm:$0xff]  ;;  %v348_v62 = vpack.c.bf16 %v288_v57, %v284_v56  ;;  %v349_v63 = vpack.c.bf16 %v289_v59, %v285_v58  ;;  %v292_v1 = vld [vmem:[%s2038_s12 + $0x48] sm:$0xff] }
  0x3c   : > { %v311_v33 = vld [vmem:[%s2038_s12 + $0xe0] sm:$0xff]  ;;  %v290_v61 = vld [vmem:[%s2038_s12 + $0x38] sm:$0xff]  ;;  %v296_v2 = vld [vmem:[%s2038_s12 + $0x68] sm:$0xff] }
  0x3d   : > { %v323_v34 = vld [vmem:[%s2038_s12 + $0x140] sm:$0xff]  ;;  %v359_v41 = vpack.c.bf16 %v311_v33, %v307_v32  ;;  %v350_v0 = vpack.c.bf16 %v290_v61, %v286_v60  ;;  %v293_v3 = vld [vmem:[%s2038_s12 + $0x50] sm:$0xff]  ;;  %v300_v10 = vld [vmem:[%s2038_s12 + $0x88] sm:$0xff] }
  0x3e   : > { %1647 = vmatpush.bf16.msra.mxu1 %v1598_v4  ;;  %1648 = vmatpush.bf16.msra.mxu2 %v1598_v4  ;;  %v327_v35 = vld [vmem:[%s2038_s12 + $0x160] sm:$0xff]  ;;  %v304_v11 = vld [vmem:[%s2038_s12 + $0xa8] sm:$0xff]  ;;  %v301_v12 = vld [vmem:[%s2038_s12 + $0x90] sm:$0xff] }
  0x3f   : > { %1649 = vmatpush.bf16.msra.mxu3 %v1598_v4  ;;  %643 = vmatpush.bf16.msra.mxu0 %v1598_v4  ;;  %v339_v36 = vld [vmem:[%s2038_s12 + $0x1c0] sm:$0xff]  ;;  %v367_v42 = vpack.c.bf16 %v327_v35, %v323_v34  ;;  %v297_v4 = vld [vmem:[%s2038_s12 + $0x70] sm:$0xff]  ;;  %v312_v20 = vld [vmem:[%s2038_s12 + $0xe8] sm:$0xff] }
  0x40   : > { %v343_v37 = vld [vmem:[%s2038_s12 + $0x1e0] sm:$0xff]  ;;  %v353_v8 = vpack.c.bf16 %v297_v4, %v293_v3  ;;  %v305_v13 = vld [vmem:[%s2038_s12 + $0xb0] sm:$0xff]  ;;  %v318_v32 = vld [vmem:[%s2038_s12 + $0x118] sm:$0xff] }
  0x41   : > { %v375_v43 = vpack.c.bf16 %v343_v37, %v339_v36  ;;  %v291_v44 = vld [vmem:[%s2038_s12 + $0x40] sm:$0xff]  ;;  %v309_v21 = vld [vmem:[%s2038_s12 + $0xd0] sm:$0xff]  ;;  %v322_v33 = vld [vmem:[%s2038_s12 + $0x138] sm:$0xff] }
  0x42   : > { %1650 = vmatpush.bf16.msra.mxu1 %v1597_v5  ;;  %1651 = vmatpush.bf16.msra.mxu2 %v1597_v5  ;;  %v295_v45 = vld [vmem:[%s2038_s12 + $0x60] sm:$0xff]  ;;  %v366_v36 = vpack.c.bf16 %v322_v33, %v318_v32  ;;  %v324_v37 = vld [vmem:[%s2038_s12 + $0x148] sm:$0xff]  ;;  %v1629_v4 = vld [vmem:[#allocation6 + $0x10] sm:$0xff] }
  0x43   : > { %1652 = vmatpush.bf16.msra.mxu3 %v1597_v5  ;;  %644 = vmatpush.bf16.msra.mxu0 %v1597_v5  ;;  %v351_v49 = vpack.c.bf16 %v295_v45, %v291_v44  ;;  %v1611_v53 = vld [vmem:[#allocation4 + $0x80] sm:$0xff]  ;;  %v294_v5 = vld [vmem:[%s2038_s12 + $0x58] sm:$0xff]  ;;  %v1632_v56 = vld [vmem:[#allocation6 + $0x28] sm:$0xff] }
  0x44   : > { %v1603_v54 = vld [vmem:[#allocation4 + $0x40] sm:$0xff]  ;;  %v340_v3 = vld [vmem:[%s2038_s12 + $0x1c8] sm:$0xff] }
  0x45   : > { %v1619_v55 = vld [vmem:[#allocation4 + $0xc0] sm:$0xff] }
  0x46   : > { %1653 = vmatpush.bf16.msra.mxu1 %v1596_v6  ;;  %1654 = vmatpush.bf16.msra.mxu2 %v1596_v6  ;;  %v1631_v59 = vld [vmem:[#allocation6 + $0x20] sm:$0xff] }
  0x47   : > { %1655 = vmatpush.bf16.msra.mxu3 %v1596_v6  ;;  %645 = vmatpush.bf16.msra.mxu0 %v1596_v6  ;;  %v298_v6 = vld [vmem:[%s2038_s12 + $0x78] sm:$0xff]  ;;  %v2111_v60 = vld [vmem:[%s2244_s2] ss:$0 sm:$0xff] }
  0x48   : > { %v354_v9 = vpack.c.bf16 %v298_v6, %v294_v5  ;;  %v344_v5 = vld [vmem:[%s2038_s12 + $0x1e8] sm:$0xff]  ;;  %v341_v6 = vld [vmem:[%s2038_s12 + $0x1d0] sm:$0xff] }
  0x4a   : > { %1656 = vmatpush.bf16.msra.mxu1 %v1595_v7  ;;  %1657 = vmatpush.bf16.msra.mxu2 %v1595_v7 }
  0x4b   : > { %1658 = vmatpush.bf16.msra.mxu3 %v1595_v7  ;;  %646 = vmatpush.bf16.msra.mxu0 %v1595_v7  ;;  %v352_v7 = vpack.c.bf16 %v296_v2, %v292_v1 }
  0x4d   : > { %657 = vmatmul.bf16.vlgmr.msra.gmra.mxu1 %v355_v17  ;;  %667 = vmatmul.bf16.vlgmr.msra.gmra.mxu2 %v363_v18  ;;  %v357_v17 = vpack.c.bf16 %v305_v13, %v301_v12  ;;  %v376_v13 = vpack.c.bf16 %v344_v5, %v340_v3 }
  0x4e   : > { %737 = vmatpush.bf16.msrb.mxu2 %v1618_v14  ;;  %688 = vmatpush.bf16.msrb.mxu1 %v1610_v15  ;;  %v302_v14 = vld [vmem:[%s2038_s12 + $0x98] sm:$0xff] }
  0x4f   : > { %786 = vmatpush.bf16.msrb.mxu3 %v1626_v16  ;;  %647 = vmatmul.bf16.vlgmr.msra.gmra.mxu0 %v347_v25  ;;  %v306_v15 = vld [vmem:[%s2038_s12 + $0xb8] sm:$0xff]  ;;  %v356_v16 = vpack.c.bf16 %v304_v11, %v300_v10 }
  0x50   : > { %677 = vmatmul.bf16.vlgmr.msra.gmra.mxu3 %v371_v19  ;;  %v358_v18 = vpack.c.bf16 %v306_v15, %v302_v14  ;;  %v308_v19 = vld [vmem:[%s2038_s12 + $0xc8] sm:$0xff] }
  0x51   : > { %v360_v25 = vpack.c.bf16 %v312_v20, %v308_v19  ;;  %v1628_v15 = vld [vmem:[#allocation6 + $0x8] sm:$0xff]  ;;  %v1627_v19 = vld [vmem:[#allocation6] sm:$0xff] }
  0x52   : > { %738 = vmatpush.bf16.msrb.mxu2 %v1617_v22  ;;  %689 = vmatpush.bf16.msrb.mxu1 %v1609_v23  ;;  %v313_v22 = vld [vmem:[%s2038_s12 + $0xf0] sm:$0xff]  ;;  %v310_v23 = vld [vmem:[%s2038_s12 + $0xd8] sm:$0xff] }
  0x53   : > { %787 = vmatpush.bf16.msrb.mxu3 %v1625_v24  ;;  %v314_v24 = vld [vmem:[%s2038_s12 + $0xf8] sm:$0xff] }
  0x56   : > { %739 = vmatpush.bf16.msrb.mxu2 %v1616_v26  ;;  %690 = vmatpush.bf16.msrb.mxu1 %v1608_v27  ;;  %v361_v26 = vpack.c.bf16 %v313_v22, %v309_v21  ;;  %v362_v27 = vpack.c.bf16 %v314_v24, %v310_v23 }
  0x57   : > { %788 = vmatpush.bf16.msrb.mxu3 %v1624_v28  ;;  %v316_v28 = vld [vmem:[%s2038_s12 + $0x108] sm:$0xff] }
  0x5a   : > { %740 = vmatpush.bf16.msrb.mxu2 %v1615_v29  ;;  %691 = vmatpush.bf16.msrb.mxu1 %v1607_v30  ;;  %v320_v29 = vld [vmem:[%s2038_s12 + $0x128] sm:$0xff]  ;;  %v317_v30 = vld [vmem:[%s2038_s12 + $0x110] sm:$0xff] }
  0x5b   : > { %789 = vmatpush.bf16.msrb.mxu3 %v1623_v31  ;;  %v321_v31 = vld [vmem:[%s2038_s12 + $0x130] sm:$0xff]  ;;  %v364_v34 = vpack.c.bf16 %v320_v29, %v316_v28 }
  0x5c   : > { %v365_v35 = vpack.c.bf16 %v321_v31, %v317_v30 }
  0x5d   : > { %662 = vmatmul.bf16.gmra.mxu1 %v359_v41  ;;  %672 = vmatmul.bf16.gmra.mxu2 %v367_v42  ;;  %v326_v41 = vld [vmem:[%s2038_s12 + $0x158] sm:$0xff] }
  0x5e   : > { %741 = vmatpush.bf16.msrb.mxu2 %v1614_v38  ;;  %692 = vmatpush.bf16.msrb.mxu1 %v1606_v39  ;;  %v328_v38 = vld [vmem:[%s2038_s12 + $0x168] sm:$0xff]  ;;  %v325_v39 = vld [vmem:[%s2038_s12 + $0x150] sm:$0xff]  ;;  %v330_v42 = vld [vmem:[%s2038_s12 + $0x178] sm:$0xff] }
  0x5f   : > { %790 = vmatpush.bf16.msrb.mxu3 %v1622_v40  ;;  %652 = vmatmul.bf16.gmra.mxu0 %v351_v49  ;;  %v329_v40 = vld [vmem:[%s2038_s12 + $0x170] sm:$0xff]  ;;  %v370_v45 = vpack.c.bf16 %v330_v42, %v326_v41  ;;  %v336_v49 = vld [vmem:[%s2038_s12 + $0x1a8] sm:$0xff] }
  0x60   : > { %682 = vmatmul.bf16.gmra.mxu3 %v375_v43  ;;  %v368_v43 = vpack.c.bf16 %v328_v38, %v324_v37  ;;  %v369_v44 = vpack.c.bf16 %v329_v40, %v325_v39 }
  0x62   : > { %742 = vmatpush.bf16.msrb.mxu2 %v1613_v46  ;;  %693 = vmatpush.bf16.msrb.mxu1 %v1605_v47  ;;  %v1634_v46 = vld [vmem:[#allocation6 + $0x38] sm:$0xff]  ;;  %v1633_v47 = vld [vmem:[#allocation6 + $0x30] sm:$0xff] }
  0x63   : > { %791 = vmatpush.bf16.msrb.mxu3 %v1621_v48  ;;  %923 = vmatpush.bf16.msrb.mxu0 %v1634_v46  ;;  %v332_v48 = vld [vmem:[%s2038_s12 + $0x188] sm:$0xff] }
  0x66   : > { %743 = vmatpush.bf16.msrb.mxu2 %v1612_v50  ;;  %694 = vmatpush.bf16.msrb.mxu1 %v1604_v51  ;;  %v333_v50 = vld [vmem:[%s2038_s12 + $0x190] sm:$0xff] }
  0x67   : > { %792 = vmatpush.bf16.msrb.mxu3 %v1620_v52  ;;  %v337_v51 = vld [vmem:[%s2038_s12 + $0x1b0] sm:$0xff]  ;;  %v334_v52 = vld [vmem:[%s2038_s12 + $0x198] sm:$0xff]  ;;  %924 = vmatpush.bf16.msrb.mxu0 %v1633_v47 }
  0x6a   : > { %744 = vmatpush.bf16.msrb.mxu2 %v1611_v53  ;;  %695 = vmatpush.bf16.msrb.mxu1 %v1603_v54  ;;  %v338_v53 = vld [vmem:[%s2038_s12 + $0x1b8] sm:$0xff]  ;;  %v372_v54 = vpack.c.bf16 %v336_v49, %v332_v48 }
  0x6b   : > { %793 = vmatpush.bf16.msrb.mxu3 %v1619_v55  ;;  %v373_v55 = vpack.c.bf16 %v337_v51, %v333_v50  ;;  %v374_v58 = vpack.c.bf16 %v338_v53, %v334_v52  ;;  %925 = vmatpush.bf16.msrb.mxu0 %v1632_v56 }
  0x6d   : > { %696 = vmatmul.bf16.vlgmr.msrb.gmra.mxu1 %v348_v62  ;;  %745 = vmatmul.bf16.vlgmr.msrb.gmra.mxu2 %v349_v63 }
  0x6f   : > { %926 = vmatpush.bf16.msrb.mxu0 %v1631_v59 }
  0x70   : > { %794 = vmatmul.bf16.vlgmr.msrb.gmra.mxu3 %v350_v0  ;;  %v1630_v0 = vld [vmem:[#allocation6 + $0x18] sm:$0xff] }
  0x73   : > { %927 = vmatpush.bf16.msrb.mxu0 %v1630_v0 }
  0x77   : > { %928 = vmatpush.bf16.msrb.mxu0 %v1629_v4 }
  0x7b   : > { %929 = vmatpush.bf16.msrb.mxu0 %v1628_v15 }
  0x7d   : > { %701 = vmatmul.bf16.gmra.mxu1 %v352_v7  ;;  %750 = vmatmul.bf16.gmra.mxu2 %v353_v8  ;;  %v345_v7 = vld [vmem:[%s2038_s12 + $0x1f0] sm:$0xff]  ;;  %v342_v8 = vld [vmem:[%s2038_s12 + $0x1d8] sm:$0xff] }
  0x7e   : > { %v377_v14 = vpack.c.bf16 %v345_v7, %v341_v6 }
  0x7f   : > { %930 = vmatpush.bf16.msrb.mxu0 %v1627_v19 }
  0x80   : > { %799 = vmatmul.bf16.gmra.mxu3 %v354_v9  ;;  %v346_v9 = vld [vmem:[%s2038_s12 + $0x1f8] sm:$0xff] }
  0x8d   : > { %706 = vmatmul.bf16.gmra.mxu1 %v356_v16  ;;  %755 = vmatmul.bf16.gmra.mxu2 %v357_v17 }
  0x90   : > { %804 = vmatmul.bf16.gmra.mxu3 %v358_v18  ;;  %v378_v18 = vpack.c.bf16 %v346_v9, %v342_v8 }
  0x9d   : > { %711 = vmatmul.bf16.gmra.mxu1 %v360_v25  ;;  %760 = vmatmul.bf16.gmra.mxu2 %v361_v26 }
  0xa0   : > { %809 = vmatmul.bf16.gmra.mxu3 %v362_v27 }
  0xad   : > { %716 = vmatmul.bf16.gmra.mxu1 %v364_v34  ;;  %765 = vmatmul.bf16.gmra.mxu2 %v365_v35 }
  0xb0   : > { %814 = vmatmul.bf16.gmra.mxu3 %v366_v36 }
  0xbd   : > { %721 = vmatmul.bf16.gmra.mxu1 %v368_v43  ;;  %770 = vmatmul.bf16.gmra.mxu2 %v369_v44 }
  0xc0   : > { %819 = vmatmul.bf16.gmra.mxu3 %v370_v45 }
  0xca   : > { %v2106_v57 = vpop.f32.mrf.mxu1 }
  0xcc   : > { %v648_v25 = vpop.f32.mrf.mxu0 }
  0xcd   : > { %726 = vmatmul.bf16.gmra.mxu1 %v372_v54  ;;  %775 = vmatmul.bf16.gmra.mxu2 %v373_v55  ;;  %v649_v31 = vadd.f32 %v2111_v60, %v648_v25 }
  0xd0   : > { %824 = vmatmul.bf16.gmra.mxu3 %v374_v58  ;;  %v668_v61 = vpop.f32.mrf.mxu2 }
  0xd1   : > { %v2114_v62 = vadd.f32 %v2111_v60, %v668_v61 }
  0xd2   : > { %v2119_v2 = vpop.f32.mrf.mxu1 }
  0xd3   : > { %v678_v63 = vpop.f32.mrf.mxu3  ;;  %v661_v15 = vadd.f32 %v2111_v60, %v2119_v2 }
  0xd4   : > { %v2117_v1 = vadd.f32 %v2111_v60, %v678_v63  ;;  %v650_v32 = vpop.f32.mrf.mxu0 }
  0xd5   : > { %v651_v37 = vadd.f32 %v2111_v60, %v650_v32 }
  0xd8   : > { %v670_v10 = vpop.f32.mrf.mxu2 }
  0xd9   : > { %v2128_v11 = vadd.f32 %v2111_v60, %v670_v10  ;;  %v659_v10 = vadd.f32 %v2111_v60, %v2106_v57 }
  0xda   : > { %v2133_v17 = vpop.f32.mrf.mxu1 }
  0xdb   : > { %v680_v12 = vpop.f32.mrf.mxu3  ;;  %v664_v57 = vadd.f32 %v2111_v60, %v2133_v17 }
  0xdc   : > { %v2131_v16 = vadd.f32 %v2111_v60, %v680_v12  ;;  %v653_v40 = vpop.f32.mrf.mxu0 }
  0xdd   : > { %731 = vmatmul.bf16.gmra.mxu1 %v376_v13  ;;  %780 = vmatmul.bf16.gmra.mxu2 %v377_v14  ;;  %v654_v48 = vadd.f32 %v2111_v60, %v653_v40 }
  0xe0   : > { %829 = vmatmul.bf16.gmra.mxu3 %v378_v18  ;;  %v673_v20 = vpop.f32.mrf.mxu2 }
  0xe1   : > { %v2136_v21 = vadd.f32 %v2111_v60, %v673_v20 }
  0xe2   : > { %v2141_v24 = vpop.f32.mrf.mxu1 }
  0xe3   : > { %v683_v22 = vpop.f32.mrf.mxu3  ;;  %v666_v2 = vadd.f32 %v2111_v60, %v2141_v24 }
  0xe4   : > { %v2139_v23 = vadd.f32 %v2111_v60, %v683_v22  ;;  %v655_v54 = vpop.f32.mrf.mxu0 }
  0xe5   : > { %v656_v56 = vadd.f32 %v2111_v60, %v655_v54 }
  0xe8   : > { %v675_v26 = vpop.f32.mrf.mxu2 }
  0xe9   : > { %v2144_v27 = vadd.f32 %v2111_v60, %v675_v26 }
  0xea   : > { %v697_v30 = vpop.f32.mrf.mxu1 }
  0xeb   : > { %v685_v28 = vpop.f32.mrf.mxu3  ;;  %v698_v34 = vadd.f32 %v697_v30, %v649_v31 }
  0xec   : > { %v2147_v29 = vadd.f32 %v2111_v60, %v685_v28 }
  0xf0   : > { %v746_v33 = vpop.f32.mrf.mxu2 }
  0xf1   : > { %v747_v38 = vadd.f32 %v746_v33, %v698_v34 }
  0xf2   : > { %v699_v36 = vpop.f32.mrf.mxu1 }
  0xf3   : > { %v795_v35 = vpop.f32.mrf.mxu3  ;;  %v700_v39 = vadd.f32 %v699_v36, %v651_v37 }
  0xf4   : > { %v796_v42 = vadd.f32 %v795_v35, %v747_v38 }
  0xf6   : > { %v835_v47 = vmax.f32 %v796_v42, 0.0 }
  0xf8   : > { %v748_v41 = vpop.f32.mrf.mxu2 }
  0xf9   : > { %v749_v43 = vadd.f32 %v748_v41, %v700_v39 }
  0xfa   : > { %v702_v45 = vpop.f32.mrf.mxu1 }
  0xfb   : > { %v797_v44 = vpop.f32.mrf.mxu3  ;;  %v703_v52 = vadd.f32 %v702_v45, %v654_v48 }
  0xfc   : > { %v798_v46 = vadd.f32 %v797_v44, %v749_v43 }
  0xfe   : > { %v836_v49 = vmax.f32 %v798_v46, 0.0 }
 0x100   : > { %v851_v50 = vpack.c.bf16 %v836_v49, %v835_v47  ;;  %v751_v51 = vpop.f32.mrf.mxu2 }
 0x101   : > { %v752_v58 = vadd.f32 %v751_v51, %v703_v52 }
 0x102   : > { %931 = vmatmul.bf16.vlgmr.msrb.gmra.mxu0 %v851_v50  ;;  %v704_v55 = vpop.f32.mrf.mxu1 }
 0x103   : > { %v800_v53 = vpop.f32.mrf.mxu3  ;;  %v705_v59 = vadd.f32 %v704_v55, %v656_v56 }
 0x104   : > { %v801_v63 = vadd.f32 %v800_v53, %v752_v58 }
 0x106   : > { %v837_v6 = vmax.f32 %v801_v63, 0.0 }
 0x108   : > { %v753_v61 = vpop.f32.mrf.mxu2 }
 0x109   : > { %v754_v0 = vadd.f32 %v753_v61, %v705_v59 }
 0x10a   : > { %v707_v4 = vpop.f32.mrf.mxu1 }
 0x10b   : > { %v802_v3 = vpop.f32.mrf.mxu3  ;;  %v708_v14 = vadd.f32 %v707_v4, %v659_v10 }
 0x10c   : > { %v803_v5 = vadd.f32 %v802_v3, %v754_v0 }
 0x10e   : > { %v838_v7 = vmax.f32 %v803_v5, 0.0 }
 0x110   : > { %v852_v8 = vpack.c.bf16 %v838_v7, %v837_v6  ;;  %v756_v9 = vpop.f32.mrf.mxu2 }
 0x111   : > { %v757_v18 = vadd.f32 %v756_v9, %v708_v14 }
 0x112   : > { %936 = vmatmul.bf16.gmra.mxu0 %v852_v8  ;;  %v709_v13 = vpop.f32.mrf.mxu1 }
 0x113   : > { %v805_v12 = vpop.f32.mrf.mxu3  ;;  %v710_v19 = vadd.f32 %v709_v13, %v661_v15 }
 0x114   : > { %v806_v22 = vadd.f32 %v805_v12, %v757_v18 }
 0x116   : > { %v839_v31 = vmax.f32 %v806_v22, 0.0 }
 0x118   : > { %v758_v20 = vpop.f32.mrf.mxu2 }
 0x119   : > { %v759_v25 = vadd.f32 %v758_v20, %v710_v19 }
 0x11a   : > { %v712_v28 = vpop.f32.mrf.mxu1 }
 0x11b   : > { %v807_v26 = vpop.f32.mrf.mxu3  ;;  %v713_v37 = vadd.f32 %v712_v28, %v664_v57 }
 0x11c   : > { %v808_v30 = vadd.f32 %v807_v26, %v759_v25 }
 0x11e   : > { %v840_v32 = vmax.f32 %v808_v30, 0.0 }
 0x120   : > { %v853_v33 = vpack.c.bf16 %v840_v32, %v839_v31  ;;  %v761_v34 = vpop.f32.mrf.mxu2 }
 0x121   : > { %v762_v38 = vadd.f32 %v761_v34, %v713_v37 }
 0x122   : > { %941 = vmatmul.bf16.gmra.mxu0 %v853_v33  ;;  %v714_v36 = vpop.f32.mrf.mxu1 }
 0x123   : > { %v810_v35 = vpop.f32.mrf.mxu3  ;;  %v715_v39 = vadd.f32 %v714_v36, %v666_v2 }
 0x124   : > { %v811_v41 = vadd.f32 %v810_v35, %v762_v38 }
 0x126   : > { %v841_v46 = vmax.f32 %v811_v41, 0.0 }
 0x128   : > { %v763_v40 = vpop.f32.mrf.mxu2 }
 0x129   : > { %v764_v42 = vadd.f32 %v763_v40, %v715_v39 }
 0x12a   : > { %v717_v44 = vpop.f32.mrf.mxu1 }
 0x12b   : > { %v812_v43 = vpop.f32.mrf.mxu3  ;;  %v718_v51 = vadd.f32 %v717_v44, %v2114_v62 }
 0x12c   : > { %v813_v45 = vadd.f32 %v812_v43, %v764_v42 }
 0x12e   : > { %v842_v47 = vmax.f32 %v813_v45, 0.0 }
 0x130   : > { %v854_v48 = vpack.c.bf16 %v842_v47, %v841_v46  ;;  %v766_v49 = vpop.f32.mrf.mxu2  ;;  %v2172_v46 = vld [vmem:[%s2246_s4] ss:$0 sm:$0xff] }
 0x131   : > { %v767_v52 = vadd.f32 %v766_v49, %v718_v51 }
 0x132   : > { %946 = vmatmul.bf16.gmra.mxu0 %v854_v48  ;;  %v719_v50 = vpop.f32.mrf.mxu1 }
 0x133   : > { %v815_v17 = vpop.f32.mrf.mxu3  ;;  %v720_v60 = vadd.f32 %v719_v50, %v2128_v11 }
 0x134   : > { %v816_v53 = vadd.f32 %v815_v17, %v767_v52 }
 0x136   : > { %v843_v59 = vmax.f32 %v816_v53, 0.0 }
 0x138   : > { %v768_v24 = vpop.f32.mrf.mxu2 }
 0x139   : > { %v769_v54 = vadd.f32 %v768_v24, %v720_v60 }
 0x13a   : > { %v722_v56 = vpop.f32.mrf.mxu1 }
 0x13b   : > { %v817_v55 = vpop.f32.mrf.mxu3  ;;  %v723_v5 = vadd.f32 %v722_v56, %v2136_v21 }
 0x13c   : > { %v818_v58 = vadd.f32 %v817_v55, %v769_v54 }
 0x13e   : > { %v844_v61 = vmax.f32 %v818_v58, 0.0 }
 0x140   : > { %v855_v63 = vpack.c.bf16 %v844_v61, %v843_v59  ;;  %v771_v0 = vpop.f32.mrf.mxu2 }
 0x141   : > { %v772_v6 = vadd.f32 %v771_v0, %v723_v5 }
 0x142   : > { %951 = vmatmul.bf16.gmra.mxu0 %v855_v63  ;;  %v724_v4 = vpop.f32.mrf.mxu1 }
 0x143   : > { %v820_v3 = vpop.f32.mrf.mxu3  ;;  %v725_v62 = vadd.f32 %v724_v4, %v2144_v27 }
 0x144   : > { %v821_v11 = vadd.f32 %v820_v3, %v772_v6 }
 0x146   : > { %v845_v13 = vmax.f32 %v821_v11, 0.0 }
 0x148   : > { %v773_v7 = vpop.f32.mrf.mxu2 }
 0x149   : > { %v774_v8 = vadd.f32 %v773_v7, %v725_v62 }
 0x14a   : > { %v727_v10 = vpop.f32.mrf.mxu1 }
 0x14b   : > { %v822_v9 = vpop.f32.mrf.mxu3  ;;  %v728_v22 = vadd.f32 %v727_v10, %v2117_v1 }
 0x14c   : > { %v823_v12 = vadd.f32 %v822_v9, %v774_v8 }
 0x14e   : > { %v846_v14 = vmax.f32 %v823_v12, 0.0 }
 0x150   : > { %v856_v15 = vpack.c.bf16 %v846_v14, %v845_v13  ;;  %v776_v18 = vpop.f32.mrf.mxu2 }
 0x151   : > { %v777_v25 = vadd.f32 %v776_v18, %v728_v22 }
 0x152   : > { %956 = vmatmul.bf16.gmra.mxu0 %v856_v15  ;;  %v729_v20 = vpop.f32.mrf.mxu1 }
 0x153   : > { %v825_v19 = vpop.f32.mrf.mxu3  ;;  %v730_v21 = vadd.f32 %v729_v20, %v2131_v16 }
 0x154   : > { %v826_v27 = vadd.f32 %v825_v19, %v777_v25 }
 0x156   : > { %v847_v33 = vmax.f32 %v826_v27, 0.0 }
 0x158   : > { %v778_v26 = vpop.f32.mrf.mxu2 }
 0x159   : > { %v779_v28 = vadd.f32 %v778_v26, %v730_v21 }
 0x15a   : > { %v732_v31 = vpop.f32.mrf.mxu1 }
 0x15b   : > { %v827_v30 = vpop.f32.mrf.mxu3  ;;  %v733_v37 = vadd.f32 %v732_v31, %v2139_v23 }
 0x15c   : > { %v828_v32 = vadd.f32 %v827_v30, %v779_v28 }
 0x15e   : > { %v848_v34 = vmax.f32 %v828_v32, 0.0 }
 0x160   : > { %v857_v57 = vpack.c.bf16 %v848_v34, %v847_v33  ;;  %v781_v35 = vpop.f32.mrf.mxu2 }
 0x161   : > { %v782_v38 = vadd.f32 %v781_v35, %v733_v37 }
 0x162   : > { %961 = vmatmul.bf16.gmra.mxu0 %v857_v57  ;;  %v734_v2 = vpop.f32.mrf.mxu1 }
 0x163   : > { %v830_v36 = vpop.f32.mrf.mxu3  ;;  %v735_v1 = vadd.f32 %v734_v2, %v2147_v29 }
 0x164   : > { %v831_v16 = vadd.f32 %v830_v36, %v782_v38 }
 0x166   : > { %v849_v43 = vmax.f32 %v831_v16, 0.0 }
 0x168   : > { %v783_v39 = vpop.f32.mrf.mxu2 }
 0x169   : > { %v784_v40 = vadd.f32 %v783_v39, %v735_v1 }
 0x16b   : > { %v832_v41 = vpop.f32.mrf.mxu3 }
 0x16c   : > { %v833_v42 = vadd.f32 %v832_v41, %v784_v40 }
 0x16e   : > { %v850_v44 = vmax.f32 %v833_v42, 0.0 }
 0x170   : > { %v858_v45 = vpack.c.bf16 %v850_v44, %v849_v43 }
 0x172   : > { %966 = vmatmul.bf16.gmra.mxu0 %v858_v45 }
 0x17f   : > { %v932_v23 = vpop.f32.mrf.mxu0 }
 0x180   : > { %v976_v47 = vadd.f32 %v2172_v46, %v932_v23 }
 0x182   : > { %v1575_v48 = vmul.f32 -1.442695, %v976_v47 }
 0x184   : > { %1725 = vpow2.f32 %v1575_v48 }
 0x187   : > { %v934_v29 = vpop.f32.mrf.mxu0 }
 0x188   : > { %v977_v49 = vadd.f32 %v2172_v46, %v934_v29 }
 0x18a   : > { %v1726_v17 = vpop.eup %1725  ;;  %v1576_v50 = vmul.f32 -1.442695, %v977_v49 }
 0x18b   : > { %v1040_v51 = vadd.f32 1.0, %v1726_v17 }
 0x18c   : > { %1727 = vpow2.f32 %v1576_v50 }
 0x18d   : > { %1729 = vrcp.f32 %v1040_v51  ;;  %v1067_v59 = vand.u32 2147483648, %v1040_v51  ;;  %v1065_v0 = vand.u32 2147483647, %v1040_v51  ;;  %vm1061_vm1 = vweird.f32 %v1040_v51 }
 0x18f   : > { %v937_v52 = vpop.f32.mrf.mxu0  ;;  %v1068_v7 = vor.u32 1.1754944e-38, %v1067_v59  ;;  %vm1066_vm4 = vcmp.eq.f32.partialorder %v1065_v0, 8.507059e+37 }
 0x190   : > { %v978_v60 = vadd.f32 %v2172_v46, %v937_v52 }
 0x192   : > { %v1728_v24 = vpop.eup %1727  ;;  %v1577_v53 = vmul.f32 -1.442695, %v978_v60 }
 0x193   : > { %v1730_v54 = vpop.eup %1729  ;;  %v1041_v55 = vadd.f32 1.0, %v1728_v24 }
 0x194   : > { %v1057_v56 = vmul.f32 %v1730_v54, %v1040_v51  ;;  %1731 = vpow2.f32 %v1577_v53  ;;  %vm1062_vm0 = vweird.f32 %v1730_v54 }
 0x195   : > { %1733 = vrcp.f32 %v1041_v55  ;;  %vm1063_vm2 = vmor %vm1061_vm1, %vm1062_vm0  ;;  %v1082_v13 = vand.u32 2147483648, %v1041_v55  ;;  %v1080_v18 = vand.u32 2147483647, %v1041_v55  ;;  %vm1076_vm6 = vweird.f32 %v1041_v55 }
 0x196   : > { %v1058_v58 = vsub.f32 1.0, %v1057_v56 }
 0x197   : > { %v939_v61 = vpop.f32.mrf.mxu0  ;;  %v1083_v26 = vor.u32 1.1754944e-38, %v1082_v13  ;;  %vm1081_vm8 = vcmp.eq.f32.partialorder %v1080_v18, 8.507059e+37 }
 0x198   : > { %v1059_v63 = vmul.f32 %v1730_v54, %v1058_v58  ;;  %v979_v3 = vadd.f32 %v2172_v46, %v939_v61 }
 0x19a   : > { %v1732_v4 = vpop.eup %1731  ;;  %v1060_v5 = vadd.f32 %v1730_v54, %v1059_v63  ;;  %v1578_v6 = vmul.f32 -1.442695, %v979_v3 }
 0x19b   : > { %v1734_v62 = vpop.eup %1733  ;;  %v1042_v11 = vadd.f32 1.0, %v1732_v4 }
 0x19c   : > { %v1064_v8 = vsel %vm1063_vm2, %v1730_v54, %v1060_v5  ;;  %v1072_v9 = vmul.f32 %v1734_v62, %v1041_v55  ;;  %1735 = vpow2.f32 %v1578_v6  ;;  %vm1077_vm5 = vweird.f32 %v1734_v62 }
 0x19d   : > { %v1069_v10 = vsel %vm1066_vm4, %v1068_v7, %v1064_v8  ;;  %1737 = vrcp.f32 %v1042_v11  ;;  %vm1078_vm7 = vmor %vm1076_vm6, %vm1077_vm5  ;;  %v1097_v33 = vand.u32 2147483648, %v1042_v11  ;;  %v1095_v35 = vand.u32 2147483647, %v1042_v11 }
 0x19e   : > { %1297 = vst.msk [vmem:[%s2183_s9] sm:$0xff] %vm1296_vm3, %v1069_v10  ;;  %v1073_v12 = vsub.f32 1.0, %v1072_v9  ;;  %vm1091_vm10 = vweird.f32 %v1042_v11 }
 0x19f   : > { %v942_v14 = vpop.f32.mrf.mxu0  ;;  %v1098_v39 = vor.u32 1.1754944e-38, %v1097_v33  ;;  %vm1096_vm12 = vcmp.eq.f32.partialorder %v1095_v35, 8.507059e+37 }
 0x1a0   : > { %v1074_v15 = vmul.f32 %v1734_v62, %v1073_v12  ;;  %v980_v19 = vadd.f32 %v2172_v46, %v942_v14 }
 0x1a2   : > { %v1736_v20 = vpop.eup %1735  ;;  %v1075_v22 = vadd.f32 %v1734_v62, %v1074_v15  ;;  %v1579_v25 = vmul.f32 -1.442695, %v980_v19 }
 0x1a3   : > { %v1738_v21 = vpop.eup %1737  ;;  %v1043_v27 = vadd.f32 1.0, %v1736_v20 }
 0x1a4   : > { %v1079_v28 = vsel %vm1078_vm7, %v1734_v62, %v1075_v22  ;;  %v1087_v30 = vmul.f32 %v1738_v21, %v1042_v11  ;;  %1739 = vpow2.f32 %v1579_v25  ;;  %vm1092_vm9 = vweird.f32 %v1738_v21 }
 0x1a5   : > { %v1084_v31 = vsel %vm1081_vm8, %v1083_v26, %v1079_v28  ;;  %1741 = vrcp.f32 %v1043_v27  ;;  %vm1093_vm11 = vmor %vm1091_vm10, %vm1092_vm9  ;;  %v1112_v44 = vand.u32 2147483648, %v1043_v27  ;;  %v1110_v47 = vand.u32 2147483647, %v1043_v27 }
 0x1a6   : > { %1298 = vst.msk [vmem:[%s2183_s9 + $0x8] sm:$0xff] %vm1296_vm3, %v1084_v31  ;;  %v1088_v32 = vsub.f32 1.0, %v1087_v30  ;;  %vm1106_vm14 = vweird.f32 %v1043_v27 }
 0x1a7   : > { %v944_v34 = vpop.f32.mrf.mxu0  ;;  %v1113_v51 = vor.u32 1.1754944e-38, %v1112_v44  ;;  %vm1111_vm0 = vcmp.eq.f32.partialorder %v1110_v47, 8.507059e+37 }
 0x1a8   : > { %v1089_v57 = vmul.f32 %v1738_v21, %v1088_v32  ;;  %v981_v36 = vadd.f32 %v2172_v46, %v944_v34 }
 0x1aa   : > { %v1740_v37 = vpop.eup %1739  ;;  %v1090_v2 = vadd.f32 %v1738_v21, %v1089_v57  ;;  %v1580_v38 = vmul.f32 -1.442695, %v981_v36 }
 0x1ab   : > { %v1742_v1 = vpop.eup %1741  ;;  %v1044_v16 = vadd.f32 1.0, %v1740_v37 }
 0x1ac   : > { %v1094_v40 = vsel %vm1093_vm11, %v1738_v21, %v1090_v2  ;;  %v1102_v41 = vmul.f32 %v1742_v1, %v1043_v27  ;;  %1743 = vpow2.f32 %v1580_v38  ;;  %vm1107_vm13 = vweird.f32 %v1742_v1 }
 0x1ad   : > { %v1099_v42 = vsel %vm1096_vm12, %v1098_v39, %v1094_v40  ;;  %1745 = vrcp.f32 %v1044_v16  ;;  %vm1108_vm15 = vmor %vm1106_vm14, %vm1107_vm13  ;;  %v1127_v55 = vand.u32 2147483648, %v1044_v16  ;;  %v1125_v59 = vand.u32 2147483647, %v1044_v16 }
 0x1ae   : > { %1299 = vst.msk [vmem:[%s2183_s9 + $0x10] sm:$0xff] %vm1296_vm3, %v1099_v42  ;;  %v1103_v43 = vsub.f32 1.0, %v1102_v41  ;;  %vm1121_vm2 = vweird.f32 %v1044_v16 }
 0x1af   : > { %v947_v45 = vpop.f32.mrf.mxu0  ;;  %v1128_v5 = vor.u32 1.1754944e-38, %v1127_v55  ;;  %vm1126_vm5 = vcmp.eq.f32.partialorder %v1125_v59, 8.507059e+37 }
 0x1b0   : > { %v1104_v23 = vmul.f32 %v1742_v1, %v1103_v43  ;;  %v982_v48 = vadd.f32 %v2172_v46, %v947_v45 }
 0x1b2   : > { %v1744_v29 = vpop.eup %1743  ;;  %v1105_v49 = vadd.f32 %v1742_v1, %v1104_v23  ;;  %v1581_v17 = vmul.f32 -1.442695, %v982_v48 }
 0x1b3   : > { %v1746_v50 = vpop.eup %1745  ;;  %v1045_v52 = vadd.f32 1.0, %v1744_v29 }
 0x1b4   : > { %v1109_v60 = vsel %vm1108_vm15, %v1742_v1, %v1105_v49  ;;  %v1117_v24 = vmul.f32 %v1746_v50, %v1044_v16  ;;  %1747 = vpow2.f32 %v1581_v17  ;;  %vm1122_vm1 = vweird.f32 %v1746_v50 }
 0x1b5   : > { %v1114_v53 = vsel %vm1111_vm0, %v1113_v51, %v1109_v60  ;;  %1749 = vrcp.f32 %v1045_v52  ;;  %vm1123_vm4 = vmor %vm1121_vm2, %vm1122_vm1  ;;  %v1142_v9 = vand.u32 2147483648, %v1045_v52  ;;  %v1140_v13 = vand.u32 2147483647, %v1045_v52 }
 0x1b6   : > { %1300 = vst.msk [vmem:[%s2183_s9 + $0x18] sm:$0xff] %vm1296_vm3, %v1114_v53  ;;  %v1118_v54 = vsub.f32 1.0, %v1117_v24  ;;  %vm1136_vm7 = vweird.f32 %v1045_v52 }
 0x1b7   : > { %v949_v56 = vpop.f32.mrf.mxu0  ;;  %v1143_v22 = vor.u32 1.1754944e-38, %v1142_v9  ;;  %vm1141_vm9 = vcmp.eq.f32.partialorder %v1140_v13, 8.507059e+37 }
 0x1b8   : > { %v1119_v58 = vmul.f32 %v1746_v50, %v1118_v54  ;;  %v983_v61 = vadd.f32 %v2172_v46, %v949_v56 }
 0x1ba   : > { %v1748_v63 = vpop.eup %1747  ;;  %v1120_v0 = vadd.f32 %v1746_v50, %v1119_v58  ;;  %v1582_v3 = vmul.f32 -1.442695, %v983_v61 }
 0x1bb   : > { %v1750_v4 = vpop.eup %1749  ;;  %v1046_v6 = vadd.f32 1.0, %v1748_v63 }
 0x1bc   : > { %v1124_v62 = vsel %vm1123_vm4, %v1746_v50, %v1120_v0  ;;  %v1132_v7 = vmul.f32 %v1750_v4, %v1045_v52  ;;  %1751 = vpow2.f32 %v1582_v3  ;;  %vm1137_vm6 = vweird.f32 %v1750_v4 }
 0x1bd   : > { %v1129_v11 = vsel %vm1126_vm5, %v1128_v5, %v1124_v62  ;;  %1753 = vrcp.f32 %v1046_v6  ;;  %vm1138_vm8 = vmor %vm1136_vm7, %vm1137_vm6  ;;  %v1157_v30 = vand.u32 2147483648, %v1046_v6  ;;  %v1155_v33 = vand.u32 2147483647, %v1046_v6 }
 0x1be   : > { %1301 = vst.msk [vmem:[%s2183_s9 + $0x20] sm:$0xff] %vm1296_vm3, %v1129_v11  ;;  %v1133_v8 = vsub.f32 1.0, %v1132_v7  ;;  %vm1151_vm11 = vweird.f32 %v1046_v6 }
 0x1bf   : > { %v952_v10 = vpop.f32.mrf.mxu0  ;;  %v1158_v2 = vor.u32 1.1754944e-38, %v1157_v30  ;;  %vm1156_vm13 = vcmp.eq.f32.partialorder %v1155_v33, 8.507059e+37 }
 0x1c0   : > { %v1134_v12 = vmul.f32 %v1750_v4, %v1133_v8  ;;  %v984_v14 = vadd.f32 %v2172_v46, %v952_v10 }
 0x1c2   : > { %v1752_v15 = vpop.eup %1751  ;;  %v1135_v18 = vadd.f32 %v1750_v4, %v1134_v12  ;;  %v1583_v19 = vmul.f32 -1.442695, %v984_v14 }
 0x1c3   : > { %v1754_v20 = vpop.eup %1753  ;;  %v1047_v25 = vadd.f32 1.0, %v1752_v15 }
 0x1c4   : > { %v1139_v21 = vsel %vm1138_vm8, %v1750_v4, %v1135_v18  ;;  %v1147_v26 = vmul.f32 %v1754_v20, %v1046_v6  ;;  %1755 = vpow2.f32 %v1583_v19  ;;  %vm1152_vm10 = vweird.f32 %v1754_v20 }
 0x1c5   : > { %v1144_v27 = vsel %vm1141_vm9, %v1143_v22, %v1139_v21  ;;  %1757 = vrcp.f32 %v1047_v25  ;;  %vm1153_vm12 = vmor %vm1151_vm11, %vm1152_vm10  ;;  %v1172_v41 = vand.u32 2147483648, %v1047_v25  ;;  %v1170_v44 = vand.u32 2147483647, %v1047_v25 }
 0x1c6   : > { %1302 = vst.msk [vmem:[%s2183_s9 + $0x28] sm:$0xff] %vm1296_vm3, %v1144_v27  ;;  %v1148_v28 = vsub.f32 1.0, %v1147_v26  ;;  %vm1166_vm15 = vweird.f32 %v1047_v25 }
 0x1c7   : > { %v954_v31 = vpop.f32.mrf.mxu0  ;;  %v1173_v49 = vor.u32 1.1754944e-38, %v1172_v41  ;;  %vm1171_vm1 = vcmp.eq.f32.partialorder %v1170_v44, 8.507059e+37 }
 0x1c8   : > { %v1149_v32 = vmul.f32 %v1754_v20, %v1148_v28  ;;  %v985_v34 = vadd.f32 %v2172_v46, %v954_v31 }
 0x1ca   : > { %v1756_v57 = vpop.eup %1755  ;;  %v1150_v35 = vadd.f32 %v1754_v20, %v1149_v32  ;;  %v1584_v36 = vmul.f32 -1.442695, %v985_v34 }
 0x1cb   : > { %v1758_v37 = vpop.eup %1757  ;;  %v1048_v38 = vadd.f32 1.0, %v1756_v57 }
 0x1cc   : > { %v1154_v1 = vsel %vm1153_vm12, %v1754_v20, %v1150_v35  ;;  %v1162_v39 = vmul.f32 %v1758_v37, %v1047_v25  ;;  %1759 = vpow2.f32 %v1584_v36  ;;  %vm1167_vm14 = vweird.f32 %v1758_v37 }
 0x1cd   : > { %v1159_v16 = vsel %vm1156_vm13, %v1158_v2, %v1154_v1  ;;  %1761 = vrcp.f32 %v1048_v38  ;;  %vm1168_vm0 = vmor %vm1166_vm15, %vm1167_vm14  ;;  %v1187_v24 = vand.u32 2147483648, %v1048_v38  ;;  %v1185_v55 = vand.u32 2147483647, %v1048_v38 }
 0x1ce   : > { %1303 = vst.msk [vmem:[%s2183_s9 + $0x30] sm:$0xff] %vm1296_vm3, %v1159_v16  ;;  %v1163_v40 = vsub.f32 1.0, %v1162_v39  ;;  %vm1181_vm4 = vweird.f32 %v1048_v38 }
 0x1cf   : > { %v957_v42 = vpop.f32.mrf.mxu0  ;;  %v1188_v0 = vor.u32 1.1754944e-38, %v1187_v24  ;;  %vm1186_vm6 = vcmp.eq.f32.partialorder %v1185_v55, 8.507059e+37 }
 0x1d0   : > { %v1164_v43 = vmul.f32 %v1758_v37, %v1163_v40  ;;  %v986_v45 = vadd.f32 %v2172_v46, %v957_v42 }
 0x1d2   : > { %v1760_v23 = vpop.eup %1759  ;;  %v1165_v47 = vadd.f32 %v1758_v37, %v1164_v43  ;;  %v1585_v48 = vmul.f32 -1.442695, %v986_v45 }
 0x1d3   : > { %v1762_v29 = vpop.eup %1761  ;;  %v1049_v17 = vadd.f32 1.0, %v1760_v23 }
 0x1d4   : > { %v1169_v50 = vsel %vm1168_vm0, %v1758_v37, %v1165_v47  ;;  %v1177_v51 = vmul.f32 %v1762_v29, %v1048_v38  ;;  %1763 = vpow2.f32 %v1585_v48  ;;  %vm1182_vm2 = vweird.f32 %v1762_v29 }
 0x1d5   : > { %v1174_v52 = vsel %vm1171_vm1, %v1173_v49, %v1169_v50  ;;  %1765 = vrcp.f32 %v1049_v17  ;;  %vm1183_vm5 = vmor %vm1181_vm4, %vm1182_vm2  ;;  %v1202_v7 = vand.u32 2147483648, %v1049_v17  ;;  %v1200_v9 = vand.u32 2147483647, %v1049_v17 }
 0x1d6   : > { %1304 = vst.msk [vmem:[%s2183_s9 + $0x38] sm:$0xff] %vm1296_vm3, %v1174_v52  ;;  %v1178_v60 = vsub.f32 1.0, %v1177_v51  ;;  %vm1196_vm8 = vweird.f32 %v1049_v17 }
 0x1d7   : > { %v959_v53 = vpop.f32.mrf.mxu0  ;;  %v1203_v18 = vor.u32 1.1754944e-38, %v1202_v7  ;;  %vm1201_vm10 = vcmp.eq.f32.partialorder %v1200_v9, 8.507059e+37 }
 0x1d8   : > { %v1179_v54 = vmul.f32 %v1762_v29, %v1178_v60  ;;  %v987_v56 = vadd.f32 %v2172_v46, %v959_v53 }
 0x1da   : > { %v1764_v58 = vpop.eup %1763  ;;  %v1180_v59 = vadd.f32 %v1762_v29, %v1179_v54  ;;  %v1586_v61 = vmul.f32 -1.442695, %v987_v56 }
 0x1db   : > { %v1766_v63 = vpop.eup %1765  ;;  %v1050_v3 = vadd.f32 1.0, %v1764_v58 }
 0x1dc   : > { %v1184_v4 = vsel %vm1183_vm5, %v1762_v29, %v1180_v59  ;;  %v1192_v5 = vmul.f32 %v1766_v63, %v1049_v17  ;;  %1767 = vpow2.f32 %v1586_v61  ;;  %vm1197_vm7 = vweird.f32 %v1766_v63 }
 0x1dd   : > { %v1189_v6 = vsel %vm1186_vm6, %v1188_v0, %v1184_v4  ;;  %1769 = vrcp.f32 %v1050_v3  ;;  %vm1198_vm9 = vmor %vm1196_vm8, %vm1197_vm7  ;;  %v1217_v26 = vand.u32 2147483648, %v1050_v3  ;;  %v1215_v30 = vand.u32 2147483647, %v1050_v3 }
 0x1de   : > { %1305 = vst.msk [vmem:[%s2183_s9 + $0x40] sm:$0xff] %vm1296_vm3, %v1189_v6  ;;  %v1193_v62 = vsub.f32 1.0, %v1192_v5  ;;  %vm1211_vm12 = vweird.f32 %v1050_v3 }
 0x1df   : > { %v962_v11 = vpop.f32.mrf.mxu0  ;;  %v1218_v35 = vor.u32 1.1754944e-38, %v1217_v26  ;;  %vm1216_vm14 = vcmp.eq.f32.partialorder %v1215_v30, 8.507059e+37 }
 0x1e0   : > { %v1194_v8 = vmul.f32 %v1766_v63, %v1193_v62  ;;  %v988_v10 = vadd.f32 %v2172_v46, %v962_v11 }
 0x1e2   : > { %v1768_v12 = vpop.eup %1767  ;;  %v1195_v13 = vadd.f32 %v1766_v63, %v1194_v8  ;;  %v1587_v14 = vmul.f32 -1.442695, %v988_v10 }
 0x1e3   : > { %v1770_v15 = vpop.eup %1769  ;;  %v1051_v19 = vadd.f32 1.0, %v1768_v12 }
 0x1e4   : > { %v1199_v20 = vsel %vm1198_vm9, %v1766_v63, %v1195_v13  ;;  %v1207_v22 = vmul.f32 %v1770_v15, %v1050_v3  ;;  %1771 = vpow2.f32 %v1587_v14  ;;  %vm1212_vm11 = vweird.f32 %v1770_v15 }
 0x1e5   : > { %v1204_v25 = vsel %vm1201_vm10, %v1203_v18, %v1199_v20  ;;  %1773 = vrcp.f32 %v1051_v19  ;;  %vm1213_vm13 = vmor %vm1211_vm12, %vm1212_vm11  ;;  %v1232_v39 = vand.u32 2147483648, %v1051_v19  ;;  %v1230_v41 = vand.u32 2147483647, %v1051_v19 }
 0x1e6   : > { %1306 = vst.msk [vmem:[%s2183_s9 + $0x48] sm:$0xff] %vm1296_vm3, %v1204_v25  ;;  %v1208_v21 = vsub.f32 1.0, %v1207_v22  ;;  %vm1226_vm0 = vweird.f32 %v1051_v19 }
 0x1e7   : > { %v964_v27 = vpop.f32.mrf.mxu0  ;;  %v1233_v47 = vor.u32 1.1754944e-38, %v1232_v39  ;;  %vm1231_vm2 = vcmp.eq.f32.partialorder %v1230_v41, 8.507059e+37 }
 0x1e8   : > { %v1209_v28 = vmul.f32 %v1770_v15, %v1208_v21  ;;  %v989_v31 = vadd.f32 %v2172_v46, %v964_v27 }
 0x1ea   : > { %v1772_v32 = vpop.eup %1771  ;;  %v1210_v33 = vadd.f32 %v1770_v15, %v1209_v28  ;;  %v1588_v34 = vmul.f32 -1.442695, %v989_v31 }
 0x1eb   : > { %v1774_v57 = vpop.eup %1773  ;;  %v1052_v36 = vadd.f32 1.0, %v1772_v32 }
 0x1ec   : > { %v1214_v37 = vsel %vm1213_vm13, %v1770_v15, %v1210_v33  ;;  %v1222_v2 = vmul.f32 %v1774_v57, %v1051_v19  ;;  %1775 = vpow2.f32 %v1588_v34  ;;  %vm1227_vm15 = vweird.f32 %v1774_v57 }
 0x1ed   : > { %v1219_v38 = vsel %vm1216_vm14, %v1218_v35, %v1214_v37  ;;  %1777 = vrcp.f32 %v1052_v36  ;;  %vm1228_vm1 = vmor %vm1226_vm0, %vm1227_vm15  ;;  %v1247_v51 = vand.u32 2147483648, %v1052_v36  ;;  %v1245_v24 = vand.u32 2147483647, %v1052_v36 }
 0x1ee   : > { %1307 = vst.msk [vmem:[%s2183_s9 + $0x50] sm:$0xff] %vm1296_vm3, %v1219_v38  ;;  %v1223_v1 = vsub.f32 1.0, %v1222_v2  ;;  %vm1241_vm5 = vweird.f32 %v1052_v36 }
 0x1ef   : > { %v967_v16 = vpop.f32.mrf.mxu0  ;;  %v1248_v59 = vor.u32 1.1754944e-38, %v1247_v51  ;;  %vm1246_vm7 = vcmp.eq.f32.partialorder %v1245_v24, 8.507059e+37 }
 0x1f0   : > { %v1224_v40 = vmul.f32 %v1774_v57, %v1223_v1  ;;  %v990_v42 = vadd.f32 %v2172_v46, %v967_v16 }
 0x1f2   : > { %v1776_v43 = vpop.eup %1775  ;;  %v1225_v44 = vadd.f32 %v1774_v57, %v1224_v40  ;;  %v1589_v45 = vmul.f32 -1.442695, %v990_v42 }
 0x1f3   : > { %v1778_v23 = vpop.eup %1777  ;;  %v1053_v48 = vadd.f32 1.0, %v1776_v43 }
 0x1f4   : > { %v1229_v29 = vsel %vm1228_vm1, %v1774_v57, %v1225_v44  ;;  %v1237_v49 = vmul.f32 %v1778_v23, %v1052_v36  ;;  %1779 = vpow2.f32 %v1589_v45  ;;  %vm1242_vm4 = vweird.f32 %v1778_v23 }
 0x1f5   : > { %v1234_v17 = vsel %vm1231_vm2, %v1233_v47, %v1229_v29  ;;  %1781 = vrcp.f32 %v1053_v48  ;;  %vm1243_vm6 = vmor %vm1241_vm5, %vm1242_vm4  ;;  %v1262_v5 = vand.u32 2147483648, %v1053_v48  ;;  %v1260_v6 = vand.u32 2147483647, %v1053_v48 }
 0x1f6   : > { %1308 = vst.msk [vmem:[%s2183_s9 + $0x58] sm:$0xff] %vm1296_vm3, %v1234_v17  ;;  %v1238_v50 = vsub.f32 1.0, %v1237_v49  ;;  %vm1256_vm9 = vweird.f32 %v1053_v48 }
 0x1f7   : > { %v969_v52 = vpop.f32.mrf.mxu0  ;;  %v1263_v8 = vor.u32 1.1754944e-38, %v1262_v5  ;;  %vm1261_vm11 = vcmp.eq.f32.partialorder %v1260_v6, 8.507059e+37 }
 0x1f8   : > { %v1239_v60 = vmul.f32 %v1778_v23, %v1238_v50  ;;  %v991_v53 = vadd.f32 %v2172_v46, %v969_v52 }
 0x1fa   : > { %v1780_v54 = vpop.eup %1779  ;;  %v1240_v55 = vadd.f32 %v1778_v23, %v1239_v60  ;;  %v1590_v56 = vmul.f32 -1.442695, %v991_v53 }
 0x1fb   : > { %v1782_v58 = vpop.eup %1781  ;;  %v1054_v61 = vadd.f32 1.0, %v1780_v54 }
 0x1fc   : > { %v1244_v63 = vsel %vm1243_vm6, %v1778_v23, %v1240_v55  ;;  %v1252_v0 = vmul.f32 %v1782_v58, %v1053_v48  ;;  %1783 = vpow2.f32 %v1590_v56  ;;  %vm1257_vm8 = vweird.f32 %v1782_v58 }
 0x1fd   : > { %v1249_v3 = vsel %vm1246_vm7, %v1248_v59, %v1244_v63  ;;  %1785 = vrcp.f32 %v1054_v61  ;;  %vm1258_vm10 = vmor %vm1256_vm9, %vm1257_vm8  ;;  %v1277_v15 = vand.u32 2147483648, %v1054_v61  ;;  %v1275_v19 = vand.u32 2147483647, %v1054_v61 }
 0x1fe   : > { %1309 = vst.msk [vmem:[%s2183_s9 + $0x60] sm:$0xff] %vm1296_vm3, %v1249_v3  ;;  %v1253_v4 = vsub.f32 1.0, %v1252_v0  ;;  %vm1271_vm13 = vweird.f32 %v1054_v61 }
 0x1ff   : > { %v1278_v25 = vor.u32 1.1754944e-38, %v1277_v15  ;;  %vm1276_vm15 = vcmp.eq.f32.partialorder %v1275_v19, 8.507059e+37 }
 0x200   : > { %v1254_v46 = vmul.f32 %v1782_v58, %v1253_v4 }
 0x202   : > { %v1784_v62 = vpop.eup %1783  ;;  %v1255_v7 = vadd.f32 %v1782_v58, %v1254_v46 }
 0x203   : > { %v1786_v11 = vpop.eup %1785  ;;  %v1055_v9 = vadd.f32 1.0, %v1784_v62 }
 0x204   : > { %v1259_v10 = vsel %vm1258_vm10, %v1782_v58, %v1255_v7  ;;  %v1267_v12 = vmul.f32 %v1786_v11, %v1054_v61  ;;  %vm1272_vm12 = vweird.f32 %v1786_v11 }
 0x205   : > { %v1264_v13 = vsel %vm1261_vm11, %v1263_v8, %v1259_v10  ;;  %1787 = vrcp.f32 %v1055_v9  ;;  %vm1273_vm14 = vmor %vm1271_vm13, %vm1272_vm12  ;;  %v1292_v30 = vand.u32 2147483648, %v1055_v9  ;;  %v1290_v32 = vand.u32 2147483647, %v1055_v9 }
 0x206   : > { %1310 = vst.msk [vmem:[%s2183_s9 + $0x68] sm:$0xff] %vm1296_vm3, %v1264_v13  ;;  %v1268_v14 = vsub.f32 1.0, %v1267_v12  ;;  %vm1286_vm1 = vweird.f32 %v1055_v9 }
 0x207   : > { %v1293_v34 = vor.u32 1.1754944e-38, %v1292_v30  ;;  %vm1291_vm4 = vcmp.eq.f32.partialorder %v1290_v32, 8.507059e+37 }
 0x208   : > { %v1269_v18 = vmul.f32 %v1786_v11, %v1268_v14 }
 0x20a   : > { %v1270_v20 = vadd.f32 %v1786_v11, %v1269_v18 }
 0x20b   : > { %v1788_v22 = vpop.eup %1787 }
 0x20c   : > { %v1274_v21 = vsel %vm1273_vm14, %v1786_v11, %v1270_v20  ;;  %v1282_v26 = vmul.f32 %v1788_v22, %v1055_v9  ;;  %vm1287_vm0 = vweird.f32 %v1788_v22 }
 0x20d   : > { %v1279_v27 = vsel %vm1276_vm15, %v1278_v25, %v1274_v21  ;;  %vm1288_vm2 = vmor %vm1286_vm1, %vm1287_vm0 }
 0x20e   : > { %1311 = vst.msk [vmem:[%s2183_s9 + $0x70] sm:$0xff] %vm1296_vm3, %v1279_v27  ;;  %v1283_v28 = vsub.f32 1.0, %v1282_v26 }
 0x210   : > { %v1284_v31 = vmul.f32 %v1788_v22, %v1283_v28 }
 0x212   : > { %v1285_v33 = vadd.f32 %v1788_v22, %v1284_v31 }
 0x214   : > { %v1289_v57 = vsel %vm1288_vm2, %v1788_v22, %v1285_v33 }
 0x215   : > { %v1294_v35 = vsel %vm1291_vm4, %v1293_v34, %v1289_v57 }
 0x216   : > { %1312 = vst.msk [vmem:[%s2183_s9 + $0x78] sm:$0xff] %vm1296_vm3, %v1294_v35 }
 0x217 PF: > { %p16_p4 = scmp.ge.s32.totalorder %s2004_s13, 4   ;;  %s2252_s18 = smov %s1909_s19 }
 0x218   : > { %s2253_s19 = smov %s1913_s20  ;;  %s2254_s20 = smov %s2015_s17 }
 0x219   : > { %s2255_s21 = smov %s2004_s13  ;;  %18 = sbr.rel (!%p16_p4) target bundleno = 4 (0x4), region = 88 }
 0x21e   :  { %1335 = vsyncpa [#allocation3], 1 }
 0x21f   :  { %1337 = vsyncpa [#allocation3 + $0x1], 1 }
 0x220   :  { %1338 = vsyncpa [#allocation5], 1 }

</bundles_post_ra>
